<compile_context>
chip_gen: v6e
topology: v6e:2x2x1
jax: 0.10.0
libtpu: 0.0.40
codegen_flags: <defaults>
</compile_context>

<pallas_src>
import numpy as np
import jax
import jax.numpy as jnp
from jax.experimental import pallas as pl
from jax.experimental.pallas import tpu as pltpu

# ---- hyperparameters: classifier(dim_in, num_neurons, num_channels, mask_size, stride_size, num_group)
DIM_IN       = 100
NUM_NEURONS  = 32
NUM_CHANNELS = 4
MASK_SIZE    = 3
STRIDE_SIZE  = 2
NUM_GROUP    = 3
BATCH        = 2
NEG_SLOPE    = 0.01    # torch.nn.LeakyReLU default negative_slope

# ---- per-layer temporal lengths (VALID conv, VALID pool) -------------------
CONV_CIN  = [1, NUM_CHANNELS, NUM_CHANNELS, NUM_CHANNELS]
CONV_COUT = [NUM_CHANNELS, NUM_CHANNELS, NUM_CHANNELS, 1]
L_IN, L_CONV, L_MAX, L_POOL = [], [], [], []
_l = DIM_IN
for _ in range(4):
    _lc = _l - MASK_SIZE + 1                       # Conv1d output length
    _lm = _lc - MASK_SIZE + 1                      # stride-1 window maxima
    _lp = (_lc - MASK_SIZE) // STRIDE_SIZE + 1     # MaxPool1d output length
    L_IN.append(_l); L_CONV.append(_lc); L_MAX.append(_lm); L_POOL.append(_lp)
    _l = _lp
NUM_FEATURES = L_POOL[-1]                          # 3


def _round8(n):
    return -(-n // 8) * 8


# ---- stacked-input scratch layout (shared by all conv layers) --------------
STK_STRIDE  = _round8(BATCH * NUM_CHANNELS)        # 8 : row stride per tap block
STK_NROWS_W = MASK_SIZE * STK_STRIDE + 1           # 25: contraction size (+ ones/bias row)
STK_ROWS    = _round8(STK_NROWS_W)                 # 32
STK_W       = 128                                  # >= max(L_CONV) = 98

# ---- packed constant buffer layout (all row starts 8-aligned) --------------
def _build_layout():
    offs, r = {}, 0
    def add(name, nrows):
        nonlocal r
        offs[name] = r
        r = _round8(r + nrows)
    for i in range(4):
        add(f"conv{i}", BATCH * CONV_COUT[i])
    add("wd1", L_MAX[3])          # S4 @ W1^T  (stride-2 select folded in)
    add("bd1", 1)
    add("wd2", NUM_NEURONS)
    add("bd2", 1)
    add("wd3", NUM_NEURONS)
    add("bd3", 1)
    return offs, r


OFFS, CBUF_ROWS = _build_layout()
CBUF_COLS = 128


def pack_constants(params):
    """One-time host-side (numpy) prep: every weight/bias of the model packed
    into a single (CBUF_ROWS, 128) f32 buffer.  Conv weights are per-tap
    block-diagonal over batch, tap-concatenated, with the bias as one extra
    column; the last pool's stride-2 selection is folded into the first dense
    weight.  Call this once at parameter-load time, not per forward."""
    (cw1, cb1), (cw2, cb2), (cw3, cb3), (cw4, cb4), \
        (lw1, lb1), (lw2, lb2), (lw3, lb3) = params
    convs = [(cw1, cb1), (cw2, cb2), (cw3, cb3), (cw4, cb4)]

    buf = np.zeros((CBUF_ROWS, CBUF_COLS), np.float32)
    eye = np.eye(BATCH, dtype=np.float32)

    for i, (w, b) in enumerate(convs):
        w = np.asarray(w, np.float32)              # (Cout, Cin, K) torch layout
        b = np.asarray(b, np.float32)
        cout, cin, k = w.shape
        cat = np.zeros((BATCH * cout, STK_NROWS_W), np.float32)
        for t in range(k):
            cat[:, t * STK_STRIDE:t * STK_STRIDE + BATCH * cin] = np.kron(eye, w[:, :, t])
        cat[:, MASK_SIZE * STK_STRIDE] = np.tile(b, BATCH)      # bias column
        r = OFFS[f"conv{i}"]
        buf[r:r + cat.shape[0], :cat.shape[1]] = cat

    # stride-2 selection of the final max-pool, folded into the first dense W
    s4 = np.zeros((L_MAX[3], L_POOL[3]), np.float32)
    s4[np.arange(L_POOL[3]) * STRIDE_SIZE, np.arange(L_POOL[3])] = 1.0
    wd1 = s4 @ np.asarray(lw1, np.float32).T                    # (L_MAX[3], N)

    def put(name, a):
        a = np.asarray(a, np.float32)
        if a.ndim == 1:
            a = a.reshape(1, -1)
        r = OFFS[name]
        buf[r:r + a.shape[0], :a.shape[1]] = a

    put("wd1", wd1)
    put("bd1", lb1)
    put("wd2", np.asarray(lw2, np.float32).T)
    put("bd2", lb2)
    put("wd3", np.asarray(lw3, np.float32).T)
    put("bd3", lb3)
    return jnp.asarray(buf)


def _classifier_kernel(x_ref, c_ref, out_ref, stk_ref):
    """Whole forward pass in one kernel: 4x (conv1d -> maxpool1d -> leakyrelu)
    followed by 3 dense layers (leakyrelu, leakyrelu, sigmoid)."""
    f32 = jnp.float32
    K = MASK_SIZE

    def lrelu(v):
        return jnp.maximum(v, NEG_SLOPE * v)                    # vmul + vmax

    # Zero the stacked-input scratch once (layer-1 tap blocks are narrower than
    # the shared 8-row stride; the matching zero weight columns must multiply
    # zeros, never uninitialized VMEM), then write the ones row that folds each
    # conv bias column into the same fused dot.
    stk_ref[...] = jnp.zeros((STK_ROWS, STK_W), f32)
    stk_ref[MASK_SIZE * STK_STRIDE:MASK_SIZE * STK_STRIDE + 1, :] = jnp.ones((1, STK_W), f32)

    def conv_block(h, layer, last):
        cin, cout = CONV_CIN[layer], CONV_COUT[layer]
        bc_in, bc_out = BATCH * cin, BATCH * cout
        lc, lm = L_CONV[layer], L_MAX[layer]
        # Stack the K lane-shifted copies of h on the sublane axis so the whole
        # Conv1d (all taps, all channels, whole batch) + bias is ONE MXU dot.
        for kk in range(K):
            stk_ref[kk * STK_STRIDE:kk * STK_STRIDE + bc_in, 0:lc] = h[:, kk:kk + lc]
        r = OFFS[f"conv{layer}"]
        w = c_ref[r:r + bc_out, 0:STK_NROWS_W]
        acc = jnp.dot(w, stk_ref[0:STK_NROWS_W, 0:lc],
                      preferred_element_type=f32)                # (B*Cout, lc)
        # MaxPool1d window max (k=MASK_SIZE): elementwise max of shifted copies.
        m = acc[:, 0:lm]
        for kk in range(1, K):
            m = jnp.maximum(m, acc[:, kk:kk + lm])
        if last:
            # stride-2 lane selection folded into the first dense weight
            # (selection commutes with the elementwise LeakyReLU).
            return lrelu(m)
        # stride-2 lane subsample via a 0/1 selection dot; S built in-kernel
        # from iota compares so it never rides a DMA.
        lp = L_POOL[layer]
        rows_i = jax.lax.broadcasted_iota(jnp.int32, (lm, lp), 0)
        cols_i = jax.lax.broadcasted_iota(jnp.int32, (lm, lp), 1)
        sel = (rows_i == cols_i * STRIDE_SIZE).astype(f32)
        return lrelu(jnp.dot(m, sel, preferred_element_type=f32))

    h = x_ref[...]                                    # (B, DIM_IN), Cin = 1
    h = conv_block(h, 0, last=False)                  # (B*C, 48)
    h = conv_block(h, 1, last=False)                  # (B*C, 22)
    h = conv_block(h, 2, last=False)                  # (B*C, 9)
    f = conv_block(h, 3, last=True)                   # (B, 5); conv4 Cout=1 == torch x[:, 0, :]

    def dense(z, wname, bname, nin, nout):
        w = c_ref[OFFS[wname]:OFFS[wname] + nin, 0:nout]
        b = c_ref[OFFS[bname]:OFFS[bname] + 1, 0:nout]
        return jnp.dot(z, w, preferred_element_type=f32) + b

    z = lrelu(dense(f, "wd1", "bd1", L_MAX[3], NUM_NEURONS))     # stride-2 select folded in
    z = lrelu(dense(z, "wd2", "bd2", NUM_NEURONS, NUM_NEURONS))
    z = dense(z, "wd3", "bd3", NUM_NEURONS, NUM_GROUP)
    out_ref[...] = 1.0 / (1.0 + jnp.exp(-z))                     # exact sigmoid


def classifier_forward(x, cbuf):
    """x: (B, 1, DIM_IN); cbuf: packed constants from pack_constants()."""
    batch = x.shape[0]
    x2d = x.reshape(batch, x.shape[-1]).astype(jnp.float32)      # (B, L), Cin = 1
    vmem = pl.BlockSpec(memory_space=pltpu.MemorySpace.VMEM)
    return pl.pallas_call(
        _classifier_kernel,
        out_shape=jax.ShapeDtypeStruct((batch, NUM_GROUP), jnp.float32),
        in_specs=[vmem, vmem],
        out_specs=vmem,
        scratch_shapes=[pltpu.VMEM((STK_ROWS, STK_W), jnp.float32)],
    )(x2d, cbuf)


def reference_forward(x, params):
    """Pure-JAX reference (XLA ops) used only to sanity-check the kernel."""
    (cw1, cb1), (cw2, cb2), (cw3, cb3), (cw4, cb4), \
        (lw1, lb1), (lw2, lb2), (lw3, lb3) = params

    def lrelu(v):
        return jnp.where(v >= 0, v, NEG_SLOPE * v)

    def block(h, w, b):
        h = jax.lax.conv_general_dilated(h, w, (1,), 'VALID',
                                         dimension_numbers=('NCH', 'OIH', 'NCH'))
        h = h + b[None, :, None]
        h = jax.lax.reduce_window(h, -jnp.inf, jax.lax.max,
                                  (1, 1, MASK_SIZE), (1, 1, STRIDE_SIZE), 'VALID')
        return lrelu(h)

    h = block(x, cw1, cb1)
    h = block(h, cw2, cb2)
    h = block(h, cw3, cb3)
    h = block(h, cw4, cb4)
    f = h[:, 0, :]
    z = lrelu(f @ lw1.T + lb1)
    z = lrelu(z @ lw2.T + lb2)
    z = z @ lw3.T + lb3
    return jax.nn.sigmoid(z)


def init_params(key):
    """Deterministic synthetic init (torch-style uniform(-1/sqrt(fan_in), 1/sqrt(fan_in)))."""
    def uni(k, shape, fan_in):
        bound = float(fan_in) ** -0.5
        return jax.random.uniform(k, shape, jnp.float32, -bound, bound)

    ks = jax.random.split(key, 14)
    C, K, N, G, F = NUM_CHANNELS, MASK_SIZE, NUM_NEURONS, NUM_GROUP, NUM_FEATURES
    return [
        (uni(ks[0],  (C, 1, K), 1 * K), uni(ks[1],  (C,), 1 * K)),   # conv1
        (uni(ks[2],  (C, C, K), C * K), uni(ks[3],  (C,), C * K)),   # conv2
        (uni(ks[4],  (C, C, K), C * K), uni(ks[5],  (C,), C * K)),   # conv3
        (uni(ks[6],  (1, C, K), C * K), uni(ks[7],  (1,), C * K)),   # conv4
        (uni(ks[8],  (N, F), F),        uni(ks[9],  (N,), F)),       # Linear(num_features, num_neurons)
        (uni(ks[10], (N, N), N),        uni(ks[11], (N,), N)),       # Linear(num_neurons, num_neurons)
        (uni(ks[12], (G, N), N),        uni(ks[13], (G,), N)),       # Linear(num_neurons, num_group)
    ]


if __name__ == "__main__":
    key = jax.random.PRNGKey(0)
    kx, kp = jax.random.split(key)

    x = jax.random.normal(kx, (BATCH, 1, DIM_IN), jnp.float32)
    params = init_params(kp)

    # One-time host-side weight prep (hoisted out of the per-call path).
    cbuf = pack_constants(params)

    fwd = jax.jit(classifier_forward)
    out = jax.block_until_ready(fwd(x, cbuf))

    ref = jax.block_until_ready(reference_forward(x, params))
    assert out.shape == (BATCH, NUM_GROUP)
    assert float(jnp.max(jnp.abs(out - ref))) < 1e-3

    print("KERNEL_OK")
</pallas_src>

<mosaic_0001>
module attributes {stable_mosaic.version = 11 : i64} {
  func.func @_classifier_kernel(%arg0: memref<2x100xf32, #tpu.memory_space<vmem>>, %arg1: memref<128x128xf32, #tpu.memory_space<vmem>>, %arg2: memref<2x3xf32, #tpu.memory_space<vmem>>, %arg3: memref<32x128xf32, #tpu.memory_space<vmem>>) attributes {dimension_semantics = [], scalar_prefetch = 0 : i64, scratch_operands = 1 : i64, tpu.core_type = #tpu.core_type<tc>} {
    %cst = arith.constant 0.000000e+00 : f32
    %0 = vector.broadcast %cst : f32 to vector<32x128xf32>
    %c0 = arith.constant 0 : index
    %c0_0 = arith.constant 0 : index
    %1 = vector.load %arg3[%c0, %c0_0] : memref<32x128xf32, #tpu.memory_space<vmem>>, vector<32x128xf32>
    tpu.vector_store %arg3[%c0, %c0_0], %0 {strides = array<i32>} : memref<32x128xf32, #tpu.memory_space<vmem>>, vector<32x128xf32>,
    %cst_1 = arith.constant 1.000000e+00 : f32
    %2 = vector.broadcast %cst_1 : f32 to vector<1x128xf32>
    %c24 = arith.constant 24 : index
    %c0_2 = arith.constant 0 : index
    %3 = vector.load %arg3[%c24, %c0_2] : memref<32x128xf32, #tpu.memory_space<vmem>>, vector<1x128xf32>
    tpu.vector_store %arg3[%c24, %c0_2], %2 {strides = array<i32>} : memref<32x128xf32, #tpu.memory_space<vmem>>, vector<1x128xf32>,
    %c0_3 = arith.constant 0 : index
    %c0_4 = arith.constant 0 : index
    %4 = vector.load %arg0[%c0_3, %c0_4] : memref<2x100xf32, #tpu.memory_space<vmem>>, vector<2x100xf32>
    %5 = vector.extract_strided_slice %4 {offsets = [0, 0], sizes = [2, 98], strides = [1, 1]} : vector<2x100xf32> to vector<2x98xf32>
    %c0_5 = arith.constant 0 : index
    %c0_6 = arith.constant 0 : index
    %6 = vector.load %arg3[%c0_5, %c0_6] : memref<32x128xf32, #tpu.memory_space<vmem>>, vector<2x98xf32>
    tpu.vector_store %arg3[%c0_5, %c0_6], %5 {strides = array<i32>} : memref<32x128xf32, #tpu.memory_space<vmem>>, vector<2x98xf32>,
    %7 = vector.extract_strided_slice %4 {offsets = [0, 1], sizes = [2, 98], strides = [1, 1]} : vector<2x100xf32> to vector<2x98xf32>
    %c8 = arith.constant 8 : index
    %c0_7 = arith.constant 0 : index
    %8 = vector.load %arg3[%c8, %c0_7] : memref<32x128xf32, #tpu.memory_space<vmem>>, vector<2x98xf32>
    tpu.vector_store %arg3[%c8, %c0_7], %7 {strides = array<i32>} : memref<32x128xf32, #tpu.memory_space<vmem>>, vector<2x98xf32>,
    %9 = vector.extract_strided_slice %4 {offsets = [0, 2], sizes = [2, 98], strides = [1, 1]} : vector<2x100xf32> to vector<2x98xf32>
    %c16 = arith.constant 16 : index
    %c0_8 = arith.constant 0 : index
    %10 = vector.load %arg3[%c16, %c0_8] : memref<32x128xf32, #tpu.memory_space<vmem>>, vector<2x98xf32>
    tpu.vector_store %arg3[%c16, %c0_8], %9 {strides = array<i32>} : memref<32x128xf32, #tpu.memory_space<vmem>>, vector<2x98xf32>,
    %c0_9 = arith.constant 0 : index
    %c0_10 = arith.constant 0 : index
    %11 = vector.load %arg1[%c0_9, %c0_10] : memref<128x128xf32, #tpu.memory_space<vmem>>, vector<8x25xf32>
    %c0_11 = arith.constant 0 : index
    %c0_12 = arith.constant 0 : index
    %12 = vector.load %arg3[%c0_11, %c0_12] : memref<32x128xf32, #tpu.memory_space<vmem>>, vector<25x98xf32>
    %cst_13 = arith.constant dense<0.000000e+00> : vector<8x98xf32>
    %13 = tpu.matmul %11, %12, %cst_13 {dimension_numbers = #tpu.dot_dimension_numbers<[1], [0], [0], [1], [0, 0, 1, 1], [], []>} : vector<8x25xf32>, vector<25x98xf32>, vector<8x98xf32> -> vector<8x98xf32>
    %14 = vector.extract_strided_slice %13 {offsets = [0, 0], sizes = [8, 96], strides = [1, 1]} : vector<8x98xf32> to vector<8x96xf32>
    %15 = vector.extract_strided_slice %13 {offsets = [0, 1], sizes = [8, 96], strides = [1, 1]} : vector<8x98xf32> to vector<8x96xf32>
    %16 = arith.maximumf %14, %15 : vector<8x96xf32>
    %17 = vector.extract_strided_slice %13 {offsets = [0, 2], sizes = [8, 96], strides = [1, 1]} : vector<8x98xf32> to vector<8x96xf32>
    %18 = arith.maximumf %16, %17 : vector<8x96xf32>
    %19 = tpu.iota {dimensions = array<i32: 0>} : vector<96x48xi32>
    %20 = tpu.iota {dimensions = array<i32: 1>} : vector<96x48xi32>
    %c2_i32 = arith.constant 2 : i32
    %21 = vector.broadcast %c2_i32 : i32 to vector<96x48xi32>
    %22 = arith.muli %20, %21 : vector<96x48xi32>
    %23 = arith.cmpi eq, %19, %22 : vector<96x48xi32>
    %24 = arith.extui %23 : vector<96x48xi1> to vector<96x48xi32>
    %25 = arith.sitofp %24 : vector<96x48xi32> to vector<96x48xf32>
    %cst_14 = arith.constant dense<0.000000e+00> : vector<8x48xf32>
    %26 = tpu.matmul %18, %25, %cst_14 {dimension_numbers = #tpu.dot_dimension_numbers<[1], [0], [0], [1], [0, 0, 1, 1], [], []>} : vector<8x96xf32>, vector<96x48xf32>, vector<8x48xf32> -> vector<8x48xf32>
    %cst_15 = arith.constant 0.00999999977 : f32
    %27 = vector.broadcast %cst_15 : f32 to vector<8x48xf32>
    %28 = arith.mulf %27, %26 : vector<8x48xf32>
    %29 = arith.maximumf %26, %28 : vector<8x48xf32>
    %30 = vector.extract_strided_slice %29 {offsets = [0, 0], sizes = [8, 46], strides = [1, 1]} : vector<8x48xf32> to vector<8x46xf32>
    %c0_16 = arith.constant 0 : index
    %c0_17 = arith.constant 0 : index
    %31 = vector.load %arg3[%c0_16, %c0_17] : memref<32x128xf32, #tpu.memory_space<vmem>>, vector<8x46xf32>
    tpu.vector_store %arg3[%c0_16, %c0_17], %30 {strides = array<i32>} : memref<32x128xf32, #tpu.memory_space<vmem>>, vector<8x46xf32>,
    %32 = vector.extract_strided_slice %29 {offsets = [0, 1], sizes = [8, 46], strides = [1, 1]} : vector<8x48xf32> to vector<8x46xf32>
    %c8_18 = arith.constant 8 : index
    %c0_19 = arith.constant 0 : index
    %33 = vector.load %arg3[%c8_18, %c0_19] : memref<32x128xf32, #tpu.memory_space<vmem>>, vector<8x46xf32>
    tpu.vector_store %arg3[%c8_18, %c0_19], %32 {strides = array<i32>} : memref<32x128xf32, #tpu.memory_space<vmem>>, vector<8x46xf32>,
    %34 = vector.extract_strided_slice %29 {offsets = [0, 2], sizes = [8, 46], strides = [1, 1]} : vector<8x48xf32> to vector<8x46xf32>
    %c16_20 = arith.constant 16 : index
    %c0_21 = arith.constant 0 : index
    %35 = vector.load %arg3[%c16_20, %c0_21] : memref<32x128xf32, #tpu.memory_space<vmem>>, vector<8x46xf32>
    tpu.vector_store %arg3[%c16_20, %c0_21], %34 {strides = array<i32>} : memref<32x128xf32, #tpu.memory_space<vmem>>, vector<8x46xf32>,
    %c8_22 = arith.constant 8 : index
    %c0_23 = arith.constant 0 : index
    %36 = vector.load %arg1[%c8_22, %c0_23] : memref<128x128xf32, #tpu.memory_space<vmem>>, vector<8x25xf32>
    %c0_24 = arith.constant 0 : index
    %c0_25 = arith.constant 0 : index
    %37 = vector.load %arg3[%c0_24, %c0_25] : memref<32x128xf32, #tpu.memory_space<vmem>>, vector<25x46xf32>
    %cst_26 = arith.constant dense<0.000000e+00> : vector<8x46xf32>
    %38 = tpu.matmul %36, %37, %cst_26 {dimension_numbers = #tpu.dot_dimension_numbers<[1], [0], [0], [1], [0, 0, 1, 1], [], []>} : vector<8x25xf32>, vector<25x46xf32>, vector<8x46xf32> -> vector<8x46xf32>
    %39 = vector.extract_strided_slice %38 {offsets = [0, 0], sizes = [8, 44], strides = [1, 1]} : vector<8x46xf32> to vector<8x44xf32>
    %40 = vector.extract_strided_slice %38 {offsets = [0, 1], sizes = [8, 44], strides = [1, 1]} : vector<8x46xf32> to vector<8x44xf32>
    %41 = arith.maximumf %39, %40 : vector<8x44xf32>
    %42 = vector.extract_strided_slice %38 {offsets = [0, 2], sizes = [8, 44], strides = [1, 1]} : vector<8x46xf32> to vector<8x44xf32>
    %43 = arith.maximumf %41, %42 : vector<8x44xf32>
    %44 = tpu.iota {dimensions = array<i32: 0>} : vector<44x22xi32>
    %45 = tpu.iota {dimensions = array<i32: 1>} : vector<44x22xi32>
    %c2_i32_27 = arith.constant 2 : i32
    %46 = vector.broadcast %c2_i32_27 : i32 to vector<44x22xi32>
    %47 = arith.muli %45, %46 : vector<44x22xi32>
    %48 = arith.cmpi eq, %44, %47 : vector<44x22xi32>
    %49 = arith.extui %48 : vector<44x22xi1> to vector<44x22xi32>
    %50 = arith.sitofp %49 : vector<44x22xi32> to vector<44x22xf32>
    %cst_28 = arith.constant dense<0.000000e+00> : vector<8x22xf32>
    %51 = tpu.matmul %43, %50, %cst_28 {dimension_numbers = #tpu.dot_dimension_numbers<[1], [0], [0], [1], [0, 0, 1, 1], [], []>} : vector<8x44xf32>, vector<44x22xf32>, vector<8x22xf32> -> vector<8x22xf32>
    %cst_29 = arith.constant 0.00999999977 : f32
    %52 = vector.broadcast %cst_29 : f32 to vector<8x22xf32>
    %53 = arith.mulf %52, %51 : vector<8x22xf32>
    %54 = arith.maximumf %51, %53 : vector<8x22xf32>
    %55 = vector.extract_strided_slice %54 {offsets = [0, 0], sizes = [8, 20], strides = [1, 1]} : vector<8x22xf32> to vector<8x20xf32>
    %c0_30 = arith.constant 0 : index
    %c0_31 = arith.constant 0 : index
    %56 = vector.load %arg3[%c0_30, %c0_31] : memref<32x128xf32, #tpu.memory_space<vmem>>, vector<8x20xf32>
    tpu.vector_store %arg3[%c0_30, %c0_31], %55 {strides = array<i32>} : memref<32x128xf32, #tpu.memory_space<vmem>>, vector<8x20xf32>,
    %57 = vector.extract_strided_slice %54 {offsets = [0, 1], sizes = [8, 20], strides = [1, 1]} : vector<8x22xf32> to vector<8x20xf32>
    %c8_32 = arith.constant 8 : index
    %c0_33 = arith.constant 0 : index
    %58 = vector.load %arg3[%c8_32, %c0_33] : memref<32x128xf32, #tpu.memory_space<vmem>>, vector<8x20xf32>
    tpu.vector_store %arg3[%c8_32, %c0_33], %57 {strides = array<i32>} : memref<32x128xf32, #tpu.memory_space<vmem>>, vector<8x20xf32>,
    %59 = vector.extract_strided_slice %54 {offsets = [0, 2], sizes = [8, 20], strides = [1, 1]} : vector<8x22xf32> to vector<8x20xf32>
    %c16_34 = arith.constant 16 : index
    %c0_35 = arith.constant 0 : index
    %60 = vector.load %arg3[%c16_34, %c0_35] : memref<32x128xf32, #tpu.memory_space<vmem>>, vector<8x20xf32>
    tpu.vector_store %arg3[%c16_34, %c0_35], %59 {strides = array<i32>} : memref<32x128xf32, #tpu.memory_space<vmem>>, vector<8x20xf32>,
    %c16_36 = arith.constant 16 : index
    %c0_37 = arith.constant 0 : index
    %61 = vector.load %arg1[%c16_36, %c0_37] : memref<128x128xf32, #tpu.memory_space<vmem>>, vector<8x25xf32>
    %c0_38 = arith.constant 0 : index
    %c0_39 = arith.constant 0 : index
    %62 = vector.load %arg3[%c0_38, %c0_39] : memref<32x128xf32, #tpu.memory_space<vmem>>, vector<25x20xf32>
    %cst_40 = arith.constant dense<0.000000e+00> : vector<8x20xf32>
    %63 = tpu.matmul %61, %62, %cst_40 {dimension_numbers = #tpu.dot_dimension_numbers<[1], [0], [0], [1], [0, 0, 1, 1], [], []>} : vector<8x25xf32>, vector<25x20xf32>, vector<8x20xf32> -> vector<8x20xf32>
    %64 = vector.extract_strided_slice %63 {offsets = [0, 0], sizes = [8, 18], strides = [1, 1]} : vector<8x20xf32> to vector<8x18xf32>
    %65 = vector.extract_strided_slice %63 {offsets = [0, 1], sizes = [8, 18], strides = [1, 1]} : vector<8x20xf32> to vector<8x18xf32>
    %66 = arith.maximumf %64, %65 : vector<8x18xf32>
    %67 = vector.extract_strided_slice %63 {offsets = [0, 2], sizes = [8, 18], strides = [1, 1]} : vector<8x20xf32> to vector<8x18xf32>
    %68 = arith.maximumf %66, %67 : vector<8x18xf32>
    %69 = tpu.iota {dimensions = array<i32: 0>} : vector<18x9xi32>
    %70 = tpu.iota {dimensions = array<i32: 1>} : vector<18x9xi32>
    %c2_i32_41 = arith.constant 2 : i32
    %71 = vector.broadcast %c2_i32_41 : i32 to vector<18x9xi32>
    %72 = arith.muli %70, %71 : vector<18x9xi32>
    %73 = arith.cmpi eq, %69, %72 : vector<18x9xi32>
    %74 = arith.extui %73 : vector<18x9xi1> to vector<18x9xi32>
    %75 = arith.sitofp %74 : vector<18x9xi32> to vector<18x9xf32>
    %cst_42 = arith.constant dense<0.000000e+00> : vector<8x9xf32>
    %76 = tpu.matmul %68, %75, %cst_42 {dimension_numbers = #tpu.dot_dimension_numbers<[1], [0], [0], [1], [0, 0, 1, 1], [], []>} : vector<8x18xf32>, vector<18x9xf32>, vector<8x9xf32> -> vector<8x9xf32>
    %cst_43 = arith.constant 0.00999999977 : f32
    %77 = vector.broadcast %cst_43 : f32 to vector<8x9xf32>
    %78 = arith.mulf %77, %76 : vector<8x9xf32>
    %79 = arith.maximumf %76, %78 : vector<8x9xf32>
    %80 = vector.extract_strided_slice %79 {offsets = [0, 0], sizes = [8, 7], strides = [1, 1]} : vector<8x9xf32> to vector<8x7xf32>
    %c0_44 = arith.constant 0 : index
    %c0_45 = arith.constant 0 : index
    %81 = vector.load %arg3[%c0_44, %c0_45] : memref<32x128xf32, #tpu.memory_space<vmem>>, vector<8x7xf32>
    tpu.vector_store %arg3[%c0_44, %c0_45], %80 {strides = array<i32>} : memref<32x128xf32, #tpu.memory_space<vmem>>, vector<8x7xf32>,
    %82 = vector.extract_strided_slice %79 {offsets = [0, 1], sizes = [8, 7], strides = [1, 1]} : vector<8x9xf32> to vector<8x7xf32>
    %c8_46 = arith.constant 8 : index
    %c0_47 = arith.constant 0 : index
    %83 = vector.load %arg3[%c8_46, %c0_47] : memref<32x128xf32, #tpu.memory_space<vmem>>, vector<8x7xf32>
    tpu.vector_store %arg3[%c8_46, %c0_47], %82 {strides = array<i32>} : memref<32x128xf32, #tpu.memory_space<vmem>>, vector<8x7xf32>,
    %84 = vector.extract_strided_slice %79 {offsets = [0, 2], sizes = [8, 7], strides = [1, 1]} : vector<8x9xf32> to vector<8x7xf32>
    %c16_48 = arith.constant 16 : index
    %c0_49 = arith.constant 0 : index
    %85 = vector.load %arg3[%c16_48, %c0_49] : memref<32x128xf32, #tpu.memory_space<vmem>>, vector<8x7xf32>
    tpu.vector_store %arg3[%c16_48, %c0_49], %84 {strides = array<i32>} : memref<32x128xf32, #tpu.memory_space<vmem>>, vector<8x7xf32>,
    %c24_50 = arith.constant 24 : index
    %c0_51 = arith.constant 0 : index
    %86 = vector.load %arg1[%c24_50, %c0_51] : memref<128x128xf32, #tpu.memory_space<vmem>>, vector<2x25xf32>
    %c0_52 = arith.constant 0 : index
    %c0_53 = arith.constant 0 : index
    %87 = vector.load %arg3[%c0_52, %c0_53] : memref<32x128xf32, #tpu.memory_space<vmem>>, vector<25x7xf32>
    %cst_54 = arith.constant dense<0.000000e+00> : vector<2x7xf32>
    %88 = tpu.matmul %86, %87, %cst_54 {dimension_numbers = #tpu.dot_dimension_numbers<[1], [0], [0], [1], [0, 0, 1, 1], [], []>} : vector<2x25xf32>, vector<25x7xf32>, vector<2x7xf32> -> vector<2x7xf32>
    %89 = vector.extract_strided_slice %88 {offsets = [0, 0], sizes = [2, 5], strides = [1, 1]} : vector<2x7xf32> to vector<2x5xf32>
    %90 = vector.extract_strided_slice %88 {offsets = [0, 1], sizes = [2, 5], strides = [1, 1]} : vector<2x7xf32> to vector<2x5xf32>
    %91 = arith.maximumf %89, %90 : vector<2x5xf32>
    %92 = vector.extract_strided_slice %88 {offsets = [0, 2], sizes = [2, 5], strides = [1, 1]} : vector<2x7xf32> to vector<2x5xf32>
    %93 = arith.maximumf %91, %92 : vector<2x5xf32>
    %cst_55 = arith.constant 0.00999999977 : f32
    %94 = vector.broadcast %cst_55 : f32 to vector<2x5xf32>
    %95 = arith.mulf %94, %93 : vector<2x5xf32>
    %96 = arith.maximumf %93, %95 : vector<2x5xf32>
    %c32 = arith.constant 32 : index
    %c0_56 = arith.constant 0 : index
    %97 = vector.load %arg1[%c32, %c0_56] : memref<128x128xf32, #tpu.memory_space<vmem>>, vector<5x32xf32>
    %c40 = arith.constant 40 : index
    %c0_57 = arith.constant 0 : index
    %98 = vector.load %arg1[%c40, %c0_57] : memref<128x128xf32, #tpu.memory_space<vmem>>, vector<1x32xf32>
    %cst_58 = arith.constant dense<0.000000e+00> : vector<2x32xf32>
    %99 = tpu.matmul %96, %97, %cst_58 {dimension_numbers = #tpu.dot_dimension_numbers<[1], [0], [0], [1], [0, 0, 1, 1], [], []>} : vector<2x5xf32>, vector<5x32xf32>, vector<2x32xf32> -> vector<2x32xf32>
    %100 = vector.broadcast %98 : vector<1x32xf32> to vector<2x32xf32>
    %101 = arith.addf %99, %100 : vector<2x32xf32>
    %cst_59 = arith.constant 0.00999999977 : f32
    %102 = vector.broadcast %cst_59 : f32 to vector<2x32xf32>
    %103 = arith.mulf %102, %101 : vector<2x32xf32>
    %104 = arith.maximumf %101, %103 : vector<2x32xf32>
    %c48 = arith.constant 48 : index
    %c0_60 = arith.constant 0 : index
    %105 = vector.load %arg1[%c48, %c0_60] : memref<128x128xf32, #tpu.memory_space<vmem>>, vector<32x32xf32>
    %c80 = arith.constant 80 : index
    %c0_61 = arith.constant 0 : index
    %106 = vector.load %arg1[%c80, %c0_61] : memref<128x128xf32, #tpu.memory_space<vmem>>, vector<1x32xf32>
    %cst_62 = arith.constant dense<0.000000e+00> : vector<2x32xf32>
    %107 = tpu.matmul %104, %105, %cst_62 {dimension_numbers = #tpu.dot_dimension_numbers<[1], [0], [0], [1], [0, 0, 1, 1], [], []>} : vector<2x32xf32>, vector<32x32xf32>, vector<2x32xf32> -> vector<2x32xf32>
    %108 = vector.broadcast %106 : vector<1x32xf32> to vector<2x32xf32>
    %109 = arith.addf %107, %108 : vector<2x32xf32>
    %cst_63 = arith.constant 0.00999999977 : f32
    %110 = vector.broadcast %cst_63 : f32 to vector<2x32xf32>
    %111 = arith.mulf %110, %109 : vector<2x32xf32>
    %112 = arith.maximumf %109, %111 : vector<2x32xf32>
    %c88 = arith.constant 88 : index
    %c0_64 = arith.constant 0 : index
    %113 = vector.load %arg1[%c88, %c0_64] : memref<128x128xf32, #tpu.memory_space<vmem>>, vector<32x3xf32>
    %c120 = arith.constant 120 : index
    %c0_65 = arith.constant 0 : index
    %114 = vector.load %arg1[%c120, %c0_65] : memref<128x128xf32, #tpu.memory_space<vmem>>, vector<1x3xf32>
    %cst_66 = arith.constant dense<0.000000e+00> : vector<2x3xf32>
    %115 = tpu.matmul %112, %113, %cst_66 {dimension_numbers = #tpu.dot_dimension_numbers<[1], [0], [0], [1], [0, 0, 1, 1], [], []>} : vector<2x32xf32>, vector<32x3xf32>, vector<2x3xf32> -> vector<2x3xf32>
    %116 = vector.broadcast %114 : vector<1x3xf32> to vector<2x3xf32>
    %117 = arith.addf %115, %116 : vector<2x3xf32>
    %cst_67 = arith.constant 0.000000e+00 : f32
    %118 = vector.broadcast %cst_67 : f32 to vector<2x3xf32>
    %119 = arith.subf %118, %117 : vector<2x3xf32>
    %120 = math.exp %119 : vector<2x3xf32>
    %cst_68 = arith.constant 1.000000e+00 : f32
    %121 = vector.broadcast %cst_68 : f32 to vector<2x3xf32>
    %122 = arith.addf %121, %120 : vector<2x3xf32>
    %cst_69 = arith.constant 1.000000e+00 : f32
    %123 = vector.broadcast %cst_69 : f32 to vector<2x3xf32>
    %124 = arith.divf %123, %122 : vector<2x3xf32>
    %c0_70 = arith.constant 0 : index
    %c0_71 = arith.constant 0 : index
    %125 = vector.load %arg2[%c0_70, %c0_71] : memref<2x3xf32, #tpu.memory_space<vmem>>, vector<2x3xf32>
    tpu.vector_store %arg2[%c0_70, %c0_71], %124 {strides = array<i32>} : memref<2x3xf32, #tpu.memory_space<vmem>>, vector<2x3xf32>,
    return
  }
}

</mosaic_0001>

<bundles_post_ra>
// kernel: classifier_forward.1
= control target key start
LH: loop header
LB: loop body
LE: loop exit
PB: predicated region body
PF: predicated region fallthrough
CT: control target
= control target key end

     0   :  { %7 = vsyncpa [#allocation4], 0  ;;  %s1569_s0 = inlined_call_operand.hbm [shape: f32[2,100], index: 0, kind: input, shape index: {}]   ;;  %s1570_s1 = inlined_call_operand.hbm [shape: f32[128,128], index: 1, kind: input, shape index: {}]   ;;  %s1571_s2 = inlined_call_operand.hbm [shape: f32[2,3], index: 2, kind: output, shape index: {}]  }
   0x1   :  { %8 = vsyncpa [#allocation7], 0 }
   0x2   :  { %9 = vsyncpa [#allocation5], 0  ;;  %s1326_s9 = smov [#allocation3]   ;;  %s1327_s11 = smov [#allocation6]  }
   0x3   :  { %s16_s10 = sshll.u32 %s1326_s9, 4  ;;  %s25_s12 = sshll.u32 %s1327_s11, 4  ;;  %s17_s10 = int_to_ptr.vmem [resolvable:$true] %s16_s10  ;;  %s26_s12 = int_to_ptr.vmem [resolvable:$true] %s25_s12 }
   0x4   :  { %s1268_s13 = scalar_lea.vmem %s17_s10, 32  ;;  %p1273_p1 = scmp.lt.s32.totalorder %s17_s10, %s17_s10 }
   0x5   :  { %p1269_p0 = scmp.ne.s32.totalorder %s17_s10, %s1268_s13  ;;  %p1274_p2 = scmp.lt.s32.totalorder %s1268_s13, %s1268_s13 }
   0x7   :  { %p1275_p3 = por %p1274_p2, %p1273_p1 }
   0x9   :  { %p1276_p4 = pnand %p1275_p3, %p1269_p0 }
   0xb   :  { %1279 = shalt.err (!%p1276_p4)
}
   0xc   :  { %19 = dma.hbm_to_vmem [thread:$0]  %s1569_s0, 32, %s17_s10, [#allocation4]  }
   0xd   :  { %s1288_s16 = scalar_lea.vmem %s26_s12, 2048  ;;  %p1293_p6 = scmp.lt.s32.totalorder %s26_s12, %s26_s12 }
   0xe   :  { %p1289_p5 = scmp.ne.s32.totalorder %s26_s12, %s1288_s16  ;;  %p1294_p7 = scmp.lt.s32.totalorder %s1288_s16, %s1288_s16 }
  0x10   :  { %p1295_p8 = por %p1294_p7, %p1293_p6 }
  0x12   :  { %p1296_p9 = pnand %p1295_p8, %p1289_p5 }
  0x14   :  { %1299 = shalt.err (!%p1296_p9)
}
  0x15   :  { %s1328_s17 = smov 128   ;;  %s1329_s18 = smov 8  }
  0x16   :  { %31 = dma.hbm_to_vmem [thread:$0]  %s1570_s1, 2048, %s26_s12, [#allocation7], %s1328_s17, %s1328_s17, %s1329_s18  }
  0x17   :  { %1320 = dma.done.wait [#allocation4], 32  }
  0x18   :  { %1321 = vsyncadd [#allocation4], 4294967264 }
  0x19   :  { %1322 = dma.done.wait [#allocation7], 2048  }
  0x1a   :  { %1323 = vsyncadd [#allocation7], 4294965248  ;;  %v1330_v0 = vmov 0.0   ;;  %v1331_v1 = vmov 1.0   ;;  %v43_v2 = vld [vmem:[#allocation3] sm:$0x3]  ;;  %v147_v10 = vlaneseq }
  0x1b   :  { %38 = vst [vmem:[#allocation2] sm:$0xff] %v1330_v0  ;;  %39 = vst [vmem:[#allocation2 + $0x8] sm:$0xff] %v1330_v0  ;;  %1124 = vmatprep.subr.mxu0 %v1330_v0  ;;  %1135 = vmatprep.subr.mxu1 %v1330_v0  ;;  %vm44_vm0 = vcmask 795648   ;;  %vm64_vm1 = vcmask 1040384   ;;  %s1332_s0 = smov 126   ;;  %vm1333_vm2 = vmmov 0  }
  0x1c   :  { %40 = vst [vmem:[#allocation2 + $0x10] sm:$0xff] %v1330_v0  ;;  %41 = vst [vmem:[#allocation2 + $0x18] sm:$0xff] %v1330_v0  ;;  %51 = vrot.lane.b32.xlu0 %v43_v2, %s1332_s0  ;;  %1132 = vmatprep.mubr.msk.f32.mxu0 %vm1333_vm2, %v1330_v0  ;;  %s1334_s1 = smov 127   ;;  %v55_v9 = vld [vmem:[#allocation6] sm:$0xff]  ;;  %vm60_vm3 = vcmask 203776   ;;  %v1381_v11 = vshrl.u32 %v147_v10, 7 }
  0x1d   :  { %42 = vst [vmem:[#allocation2 + $0x18] sm:$0x1] %v1331_v1  ;;  %45 = vst.msk [vmem:[#allocation2] sm:$0x3] %vm44_vm0, %v43_v2  ;;  %1159 = vmatprep.mubr.msk.f32.mxu1 %vm1333_vm2, %v1330_v0  ;;  %v161_v12 = vand.u32 127, %v147_v10  ;;  %v286_v40 = vld [vmem:[#allocation6 + $0x8] sm:$0xff] }
  0x1e   :  { %v159_v13 = vadd.s32 88, %v1381_v11  ;;  %v158_v15 = vadd.s32 80, %v1381_v11  ;;  %v157_v16 = vadd.s32 72, %v1381_v11  ;;  %v156_v17 = vadd.s32 64, %v1381_v11  ;;  %v467_v58 = vld [vmem:[#allocation6 + $0x10] sm:$0xff]  ;;  %s1335_s21 = smov [#allocation8]  }
  0x1f   :  { %v1384_v14 = vmul.u32 2, %v161_v12  ;;  %v155_v18 = vadd.s32 56, %v1381_v11  ;;  %v154_v19 = vadd.s32 48, %v1381_v11  ;;  %v1403_v20 = vadd.s32 40, %v1381_v11  ;;  %s1007_s22 = sshll.u32 %s1335_s21, 4  ;;  %s1008_s22 = int_to_ptr.vmem [resolvable:$true] %s1007_s22 }
  0x20   :  { %47 = vrot.lane.b32.xlu0 %v43_v2, %s1334_s1  ;;  %v1409_v21 = vadd.s32 32, %v1381_v11  ;;  %v1416_v22 = vadd.s32 24, %v1381_v11  ;;  %v1440_v23 = vadd.s32 16, %v1381_v11  ;;  %v1445_v24 = vadd.s32 8, %v1381_v11  ;;  %s1300_s23 = scalar_lea.vmem %s1008_s22, 32  ;;  %p1305_p11 = scmp.lt.s32.totalorder %s1008_s22, %s1008_s22 }
  0x21   :  { %vm174_vm4 = vcmp.eq.s32.totalorder %v159_v13, %v1384_v14  ;;  %vm173_vm5 = vcmp.eq.s32.totalorder %v158_v15, %v1384_v14  ;;  %vm172_vm6 = vcmp.eq.s32.totalorder %v157_v16, %v1384_v14  ;;  %vm171_vm7 = vcmp.eq.s32.totalorder %v156_v17, %v1384_v14  ;;  %v648_v13 = vld [vmem:[#allocation6 + $0x18] sm:$0x3]  ;;  %v740_v15 = vld [vmem:[#allocation6 + $0x20] sm:$0x1f]  ;;  %p1301_p10 = scmp.ne.s32.totalorder %s1008_s22, %s1300_s23  ;;  %p1306_p12 = scmp.lt.s32.totalorder %s1300_s23, %s1300_s23 }
  0x22   :  { %1136 = vmatpush3.msk.msra.mxu1 %vm174_vm4, %v1331_v1  ;;  %vm170_vm8 = vcmp.eq.s32.totalorder %v155_v18, %v1384_v14  ;;  %vm169_vm9 = vcmp.eq.s32.totalorder %v154_v19, %v1384_v14  ;;  %vm168_vm10 = vcmp.eq.s32.totalorder %v1403_v20, %v1384_v14  ;;  %vm167_vm11 = vcmp.eq.s32.totalorder %v1409_v21, %v1384_v14 }
  0x23   :  { %1137 = vmatprep.subr.mxu1 %v1330_v0  ;;  %vm166_vm12 = vcmp.eq.s32.totalorder %v1416_v22, %v1384_v14  ;;  %vm165_vm13 = vcmp.eq.s32.totalorder %v1440_v23, %v1384_v14  ;;  %vm164_vm14 = vcmp.eq.s32.totalorder %v1445_v24, %v1384_v14  ;;  %vm163_vm15 = vcmp.eq.s32.totalorder %v1381_v11, %v1384_v14  ;;  %v829_v24 = vld [vmem:[#allocation6 + $0x48] sm:$0xff]  ;;  %p1307_p13 = por %p1306_p12, %p1305_p11 }
  0x24   :  { %v59_v3 = vld [vmem:[#allocation2 + $0x18] sm:$0x1]  ;;  %v56_v8 = vld [vmem:[#allocation2] sm:$0xff]  ;;  %1138 = vmatpush3.msk.msra.mxu1 %vm173_vm5, %v1331_v1  ;;  %vm275_vm4 = vcmask 375808   ;;  %v1024_v42 = vsel %vm168_vm10, 1.0, %v1330_v0  ;;  %vm380_vm5 = vcmask 1043456  }
  0x25   :  { %1125 = vmatpush3.msk.msra.mxu0 %vm64_vm1, %v59_v3  ;;  %1139 = vmatprep.subr.mxu1 %v1330_v0  ;;  %v290_v31 = vld [vmem:[#allocation2 + $0x18] sm:$0x1]  ;;  %v1021_v60 = vsel %vm165_vm13, 1.0, %v1330_v0  ;;  %p1308_p0 = pnand %p1307_p13, %p1301_p10 }
  0x26   :  { %1126 = vmatprep.subr.mxu0 %v1330_v0  ;;  %1140 = vmatpush3.msk.msra.mxu1 %vm172_vm6, %v1331_v1  ;;  %vm376_vm6 = vcmask 359424   ;;  %v471_v49 = vld [vmem:[#allocation2 + $0x18] sm:$0x1] }
  0x27   :  { %1141 = vmatprep.subr.mxu1 %v1330_v0 }
  0x28   :  { %1142 = vmatpush3.msk.msra.mxu1 %vm171_vm7, %v1331_v1  ;;  %vm456_vm7 = vcmask 162816  }
  0x29   :  { %1143 = vmatprep.subr.mxu1 %v1330_v0 }
  0x2a   :  { %1144 = vmatpush3.msk.msra.mxu1 %vm170_vm8, %v1331_v1  ;;  %vm561_vm8 = vcmask 1041408  }
  0x2b   :  { %1145 = vmatprep.subr.mxu1 %v1330_v0 }
  0x2c   :  { %1146 = vmatpush3.msk.msra.mxu1 %vm169_vm9, %v1331_v1  ;;  %vm557_vm9 = vcmask 146432  }
  0x2d   :  { %1147 = vmatprep.subr.mxu1 %v1330_v0 }
  0x2e   :  { %1148 = vmatpush3.msk.msra.mxu1 %vm168_vm10, %v1331_v1  ;;  %vm637_vm10 = vcmask 56320  }
  0x2f   :  { %1149 = vmatprep.subr.mxu1 %v1330_v0 }
  0x30   :  { %1150 = vmatpush3.msk.msra.mxu1 %vm167_vm11, %v1331_v1 }
  0x31   :  { %1151 = vmatprep.subr.mxu1 %v1330_v0 }
  0x32   :  { %1152 = vmatpush3.msk.msra.mxu1 %vm166_vm12, %v1331_v1 }
  0x33   :  { %1153 = vmatprep.subr.mxu1 %v1330_v0 }
  0x34   :  { %1154 = vmatpush3.msk.msra.mxu1 %vm165_vm13, %v1331_v1 }
  0x35   :  { %1155 = vmatprep.subr.mxu1 %v1330_v0 }
  0x36   :  { %1156 = vmatpush3.msk.msra.mxu1 %vm164_vm14, %v1331_v1 }
  0x37   :  { %1157 = vmatprep.subr.mxu1 %v1330_v0 }
  0x38   :  { %1158 = vmatpush3.msk.msra.mxu1 %vm163_vm15, %v1331_v1 }
  0x39   :  { %1188 = vmatprep.subr.mxu1 %v1330_v0 }
  0x8e   :  { %v52_v4 = vpop.permute.xlu0 %51 }
  0x8f   :  { %54 = vst.msk [vmem:[#allocation2 + $0x10] sm:$0x3] %vm44_vm0, %v52_v4 }
  0x92   :  { %v48_v5 = vpop.permute.xlu0 %47 }
  0x93   :  { %50 = vst.msk [vmem:[#allocation2 + $0x8] sm:$0x3] %vm44_vm0, %v48_v5  ;;  %vm199_vm0 = vcmask 785408   ;;  %v652_v5 = vld [vmem:[#allocation2 + $0x18] sm:$0x1] }
  0x96   :  { %v58_v6 = vld [vmem:[#allocation2 + $0x10] sm:$0xff] }
  0x97   :  { %1127 = vmatpush3.msra.mxu0 %v58_v6 }
  0x98   :  { %1128 = vmatprep.subr.mxu0 %v1330_v0 }
  0x9a   :  { %v57_v7 = vld [vmem:[#allocation2 + $0x8] sm:$0xff] }
  0x9b   :  { %1129 = vmatpush3.msra.mxu0 %v57_v7 }
  0x9c   :  { %1130 = vmatprep.subr.mxu0 %v1330_v0 }
  0x9d   :  { %1131 = vmatpush3.msra.mxu0 %v56_v8 }
  0x9e   :  { %1133 = vmatmul.mubr.msk.f32.vlgmr.msra.gmra.mxu0 %vm60_vm3, %v55_v9  ;;  %1162 = vmatprep.subr.mxu0 %v1330_v0 }
  0x9f   :  { %1170 = vmatprep.mubr.msk.f32.mxu0 %vm1333_vm2, %v1330_v0  ;;  %1163 = vmatpush3.msk.msra.mxu0 %vm64_vm1, %v290_v31 }
  0xa0   :  { %1164 = vmatprep.subr.mxu0 %v1330_v0 }
 0x15e   :  { %v134_v25 = vpop.f32.mrf.mxu0 }
 0x15f   :  { %139 = vrot.lane.b32.xlu1 %v134_v25, %s1334_s1 }
 0x160   :  { %v1134_v26 = vpop.f32.mrf.mxu0 }
 0x161   :  { %v827_v26 = vld [vmem:[#allocation6 + $0x38] sm:$0xff] }
 0x163   :  { %143 = vrot.lane.b32.xlu1 %v134_v25, %s1332_s0 }
 0x1d1   :  { %v140_v27 = vpop.permute.xlu1 %139 }
 0x1d2   :  { %v142_v28 = vmax.f32 %v134_v25, %v140_v27  ;;  %v828_v25 = vld [vmem:[#allocation6 + $0x40] sm:$0xff]  ;;  %v826_v27 = vld [vmem:[#allocation6 + $0x30] sm:$0xff] }
 0x1d5   :  { %v144_v29 = vpop.permute.xlu1 %143 }
 0x1d6   :  { %v146_v30 = vmax.f32 %v142_v28, %v144_v29  ;;  %v1061_v28 = vld [vmem:[#allocation6 + $0x28] ss:$0 sm:$0xff] }
 0x1d8   :  { %1160 = vmatmul.mubr.msk.f32.vlgmr.msra.gmra.mxu1 %vm199_vm0, %v146_v30 }
 0x1d9   :  { %1196 = vmatprep.mubr.msk.f32.mxu1 %vm1333_vm2, %v1330_v0  ;;  %1189 = vmatpush3.msk.msra.mxu1 %vm64_vm1, %v471_v49 }
 0x1da   :  { %1190 = vmatprep.subr.mxu1 %v1330_v0 }
 0x298   :  { %v269_v32 = vpop.f32.mrf.mxu1 }
 0x299   :  { %v273_v33 = vmul.f32 0.01, %v269_v32 }
 0x29a   :  { %v1161_v34 = vpop.f32.mrf.mxu1 }
 0x29b   :  { %v274_v35 = vmax.f32 %v269_v32, %v273_v33  ;;  %v914_v34 = vld [vmem:[#allocation6 + $0x70] sm:$0xff] }
 0x29d   :  { %278 = vrot.lane.b32.xlu1 %v274_v35, %s1334_s1  ;;  %282 = vrot.lane.b32.xlu0 %v274_v35, %s1332_s0  ;;  %276 = vst.msk [vmem:[#allocation2] sm:$0xff] %vm275_vm4, %v274_v35  ;;  %v913_v35 = vld [vmem:[#allocation6 + $0x68] sm:$0xff] }
 0x2a4   :  { %v287_v41 = vld [vmem:[#allocation2] sm:$0xff] }
 0x30f   :  { %v279_v36 = vpop.permute.xlu1 %278  ;;  %v283_v37 = vpop.permute.xlu0 %282 }
 0x310   :  { %281 = vst.msk [vmem:[#allocation2 + $0x8] sm:$0xff] %vm275_vm4, %v279_v36  ;;  %285 = vst.msk [vmem:[#allocation2 + $0x10] sm:$0xff] %vm275_vm4, %v283_v37  ;;  %v912_v36 = vld [vmem:[#allocation6 + $0x60] sm:$0xff]  ;;  %v911_v37 = vld [vmem:[#allocation6 + $0x58] sm:$0xff] }
 0x317   :  { %v289_v38 = vld [vmem:[#allocation2 + $0x10] sm:$0xff]  ;;  %v288_v39 = vld [vmem:[#allocation2 + $0x8] sm:$0xff] }
 0x318   :  { %1165 = vmatpush3.msra.mxu0 %v289_v38  ;;  %v1064_v38 = vld [vmem:[#allocation6 + $0x50] ss:$0 sm:$0xff] }
 0x319   :  { %1166 = vmatprep.subr.mxu0 %v1330_v0 }
 0x31a   :  { %1167 = vmatpush3.msra.mxu0 %v288_v39 }
 0x31b   :  { %1168 = vmatprep.subr.mxu0 %v1330_v0 }
 0x31c   :  { %1169 = vmatpush3.msra.mxu0 %v287_v41 }
 0x31d   :  { %1171 = vmatmul.mubr.msk.f32.vlgmr.msra.gmra.mxu0 %vm60_vm3, %v286_v40  ;;  %1173 = vmatprep.subr.mxu0 %v1330_v0 }
 0x31e   :  { %1185 = vmatprep.mubr.msk.f32.mxu0 %vm1333_vm2, %v1330_v0  ;;  %1174 = vmatpush3.msk.msra.mxu0 %vm380_vm5, %v1024_v42 }
 0x31f   :  { %1175 = vmatprep.subr.mxu0 %v1330_v0 }
 0x320   :  { %1176 = vmatpush3.msk.msra.mxu0 %vm167_vm11, %v1331_v1  ;;  %vm999_vm11 = vcmask 17408  }
 0x321   :  { %1177 = vmatprep.subr.mxu0 %v1330_v0 }
 0x322   :  { %1178 = vmatpush3.msk.msra.mxu0 %vm166_vm12, %v1331_v1 }
 0x323   :  { %1179 = vmatprep.subr.mxu0 %v1330_v0 }
 0x324   :  { %1180 = vmatpush3.msk.msra.mxu0 %vm165_vm13, %v1331_v1 }
 0x325   :  { %1181 = vmatprep.subr.mxu0 %v1330_v0 }
 0x326   :  { %1182 = vmatpush3.msk.msra.mxu0 %vm164_vm14, %v1331_v1 }
 0x327   :  { %1183 = vmatprep.subr.mxu0 %v1330_v0 }
 0x328   :  { %1184 = vmatpush3.msk.msra.mxu0 %vm163_vm15, %v1331_v1 }
 0x329   :  { %1199 = vmatprep.subr.mxu0 %v1330_v0 }
 0x3dd   :  { %v363_v43 = vpop.f32.mrf.mxu0 }
 0x3de   :  { %372 = vrot.lane.b32.xlu1 %v363_v43, %s1332_s0  ;;  %368 = vrot.lane.b32.xlu0 %v363_v43, %s1334_s1 }
 0x3df   :  { %v1172_v44 = vpop.f32.mrf.mxu0 }
 0x3e0   :  { %v1066_v44 = vld [vmem:[#allocation6 + $0x78] ss:$0 sm:$0xff] }
 0x450   :  { %v369_v45 = vpop.permute.xlu0 %368  ;;  %v373_v47 = vpop.permute.xlu1 %372 }
 0x451   :  { %v371_v46 = vmax.f32 %v363_v43, %v369_v45 }
 0x453   :  { %v375_v48 = vmax.f32 %v371_v46, %v373_v47 }
 0x455   :  { %1186 = vmatmul.mubr.msk.f32.vlgmr.msra.gmra.mxu0 %vm376_vm6, %v375_v48 }
 0x456   :  { %1205 = vmatprep.mubr.msk.f32.mxu0 %vm1333_vm2, %v1330_v0  ;;  %1200 = vmatpush3.msk.msra.mxu0 %vm561_vm8, %v1021_v60 }
 0x457   :  { %1201 = vmatprep.subr.mxu0 %v1330_v0 }
 0x458   :  { %1202 = vmatpush3.msk.msra.mxu0 %vm164_vm14, %v1331_v1 }
 0x459   :  { %1203 = vmatprep.subr.mxu0 %v1330_v0 }
 0x45a   :  { %1204 = vmatpush3.msk.msra.mxu0 %vm163_vm15, %v1331_v1 }
 0x45b   :  { %1219 = vmatprep.subr.mxu0 %v1330_v0 }
 0x515   :  { %v450_v50 = vpop.f32.mrf.mxu0 }
 0x516   :  { %v454_v51 = vmul.f32 0.01, %v450_v50 }
 0x517   :  { %v1187_v52 = vpop.f32.mrf.mxu0 }
 0x518   :  { %v455_v53 = vmax.f32 %v450_v50, %v454_v51 }
 0x51a   :  { %459 = vrot.lane.b32.xlu1 %v455_v53, %s1334_s1  ;;  %463 = vrot.lane.b32.xlu0 %v455_v53, %s1332_s0  ;;  %457 = vst.msk [vmem:[#allocation2] sm:$0xff] %vm456_vm7, %v455_v53 }
 0x521   :  { %v468_v59 = vld [vmem:[#allocation2] sm:$0xff] }
 0x58c   :  { %v460_v54 = vpop.permute.xlu1 %459  ;;  %v464_v55 = vpop.permute.xlu0 %463 }
 0x58d   :  { %462 = vst.msk [vmem:[#allocation2 + $0x8] sm:$0xff] %vm456_vm7, %v460_v54  ;;  %466 = vst.msk [vmem:[#allocation2 + $0x10] sm:$0xff] %vm456_vm7, %v464_v55 }
 0x594   :  { %v470_v56 = vld [vmem:[#allocation2 + $0x10] sm:$0xff]  ;;  %v469_v57 = vld [vmem:[#allocation2 + $0x8] sm:$0xff] }
 0x595   :  { %1191 = vmatpush3.msra.mxu1 %v470_v56 }
 0x596   :  { %1192 = vmatprep.subr.mxu1 %v1330_v0 }
 0x597   :  { %1193 = vmatpush3.msra.mxu1 %v469_v57 }
 0x598   :  { %1194 = vmatprep.subr.mxu1 %v1330_v0 }
 0x599   :  { %1195 = vmatpush3.msra.mxu1 %v468_v59 }
 0x59a   :  { %1197 = vmatmul.mubr.msk.f32.vlgmr.msra.gmra.mxu1 %vm60_vm3, %v467_v58  ;;  %1208 = vmatprep.subr.mxu1 %v1330_v0 }
 0x59b   :  { %1216 = vmatprep.mubr.msk.f32.mxu1 %vm1333_vm2, %v1330_v0  ;;  %1209 = vmatpush3.msk.msra.mxu1 %vm64_vm1, %v652_v5  ;;  %vm750_vm1 = vcmask 1044480  }
 0x59c   :  { %1210 = vmatprep.subr.mxu1 %v1330_v0 }
 0x65a   :  { %v544_v61 = vpop.f32.mrf.mxu1 }
 0x65b   :  { %553 = vrot.lane.b32.xlu1 %v544_v61, %s1332_s0  ;;  %549 = vrot.lane.b32.xlu0 %v544_v61, %s1334_s1 }
 0x65c   :  { %v1198_v62 = vpop.f32.mrf.mxu1 }
 0x6cd   :  { %v550_v63 = vpop.permute.xlu0 %549  ;;  %v554_v3 = vpop.permute.xlu1 %553 }
 0x6ce   :  { %v552_v2 = vmax.f32 %v544_v61, %v550_v63 }
 0x6d0   :  { %v556_v4 = vmax.f32 %v552_v2, %v554_v3 }
 0x6d2   :  { %1206 = vmatmul.mubr.msk.f32.vlgmr.msra.gmra.mxu0 %vm557_vm9, %v556_v4 }
 0x6d3   :  { %1221 = vmatprep.mubr.msk.f32.mxu0 %vm1333_vm2, %v1330_v0  ;;  %1220 = vmatpush3.msk.msra.mxu0 %vm750_vm1, %v740_v15 }
 0x6d4   :  { %1224 = vmatprep.subr.mxu0 %v1330_v0 }
 0x792   :  { %v631_v1 = vpop.f32.mrf.mxu0 }
 0x793   :  { %v635_v6 = vmul.f32 0.01, %v631_v1 }
 0x794   :  { %v1207_v7 = vpop.f32.mrf.mxu0 }
 0x795   :  { %v636_v8 = vmax.f32 %v631_v1, %v635_v6 }
 0x797   :  { %640 = vrot.lane.b32.xlu1 %v636_v8, %s1334_s1  ;;  %644 = vrot.lane.b32.xlu0 %v636_v8, %s1332_s0  ;;  %638 = vst.msk [vmem:[#allocation2] sm:$0xff] %vm637_vm10, %v636_v8 }
 0x79e   :  { %v649_v14 = vld [vmem:[#allocation2] sm:$0xff] }
 0x809   :  { %v641_v9 = vpop.permute.xlu1 %640  ;;  %v645_v10 = vpop.permute.xlu0 %644 }
 0x80a   :  { %643 = vst.msk [vmem:[#allocation2 + $0x8] sm:$0xff] %vm637_vm10, %v641_v9  ;;  %647 = vst.msk [vmem:[#allocation2 + $0x10] sm:$0xff] %vm637_vm10, %v645_v10 }
 0x811   :  { %v651_v11 = vld [vmem:[#allocation2 + $0x10] sm:$0xff]  ;;  %v650_v12 = vld [vmem:[#allocation2 + $0x8] sm:$0xff] }
 0x812   :  { %1211 = vmatpush3.msra.mxu1 %v651_v11 }
 0x813   :  { %1212 = vmatprep.subr.mxu1 %v1330_v0 }
 0x814   :  { %1213 = vmatpush3.msra.mxu1 %v650_v12 }
 0x815   :  { %1214 = vmatprep.subr.mxu1 %v1330_v0 }
 0x816   :  { %1215 = vmatpush3.msra.mxu1 %v649_v14 }
 0x817   :  { %1217 = vmatmul.mubr.msk.f32.vlgmr.msra.gmra.mxu1 %vm60_vm3, %v648_v13  ;;  %1235 = vmatprep.subr.mxu1 %v1330_v0  ;;  %vm746_vm3 = vcmask 39936  }
 0x818   :  { %1243 = vmatprep.mubr.msk.f32.mxu1 %vm1333_vm2, %v1330_v0  ;;  %1236 = vmatpush3.msra.mxu1 %v914_v34 }
 0x819   :  { %1237 = vmatprep.subr.mxu1 %v1330_v0 }
 0x81a   :  { %1238 = vmatpush3.msra.mxu1 %v913_v35 }
 0x81b   :  { %1239 = vmatprep.subr.mxu1 %v1330_v0 }
 0x81c   :  { %1240 = vmatpush3.msra.mxu1 %v912_v36 }
 0x81d   :  { %1241 = vmatprep.subr.mxu1 %v1330_v0 }
 0x81e   :  { %1242 = vmatpush3.msra.mxu1 %v911_v37 }
 0x8d7   :  { %v725_v16 = vpop.f32.mrf.mxu1 }
 0x8d8   :  { %734 = vrot.lane.b32.xlu1 %v725_v16, %s1332_s0  ;;  %730 = vrot.lane.b32.xlu0 %v725_v16, %s1334_s1 }
 0x8d9   :  { %v1218_v17 = vpop.f32.mrf.mxu1 }
 0x94a   :  { %v731_v18 = vpop.permute.xlu0 %730  ;;  %v735_v20 = vpop.permute.xlu1 %734 }
 0x94b   :  { %v733_v19 = vmax.f32 %v725_v16, %v731_v18 }
 0x94d   :  { %v737_v21 = vmax.f32 %v733_v19, %v735_v20 }
 0x94f   :  { %v738_v22 = vmul.f32 0.01, %v737_v21 }
 0x951   :  { %v739_v23 = vmax.f32 %v737_v21, %v738_v22 }
 0x953   :  { %1222 = vmatmul.mubr.msk.f32.vlgmr.msra.gmra.mxu0 %vm746_vm3, %v739_v23 }
 0x954   :  { %1232 = vmatprep.mubr.msk.f32.mxu0 %vm1333_vm2, %v1330_v0  ;;  %1225 = vmatpush3.msra.mxu0 %v829_v24  ;;  %vm835_vm2 = vcmask 261120  }
 0x955   :  { %1226 = vmatprep.subr.mxu0 %v1330_v0 }
 0x956   :  { %1227 = vmatpush3.msra.mxu0 %v828_v25 }
 0x957   :  { %1228 = vmatprep.subr.mxu0 %v1330_v0 }
 0x958   :  { %1229 = vmatpush3.msra.mxu0 %v827_v26 }
 0x959   :  { %1230 = vmatprep.subr.mxu0 %v1330_v0 }
 0x95a   :  { %1231 = vmatpush3.msra.mxu0 %v826_v27 }
 0xa13   :  { %v820_v29 = vpop.f32.mrf.mxu0 }
 0xa14   :  { %v821_v30 = vadd.f32 %v1061_v28, %v820_v29 }
 0xa15   :  { %v1223_v31 = vpop.f32.mrf.mxu0 }
 0xa16   :  { %v824_v32 = vmul.f32 0.01, %v821_v30 }
 0xa18   :  { %v825_v33 = vmax.f32 %v821_v30, %v824_v32 }
 0xa1a   :  { %1233 = vmatmul.mubr.msk.f32.vlgmr.msra.gmra.mxu0 %vm835_vm2, %v825_v33 }
 0xada   :  { %v905_v39 = vpop.f32.mrf.mxu0 }
 0xadb   :  { %v906_v40 = vadd.f32 %v1064_v38, %v905_v39 }
 0xadc   :  { %v1234_v41 = vpop.f32.mrf.mxu0 }
 0xadd   :  { %v909_v42 = vmul.f32 0.01, %v906_v40 }
 0xadf   :  { %v910_v43 = vmax.f32 %v906_v40, %v909_v42 }
 0xae1   :  { %1244 = vmatmul.mubr.msk.f32.vlgmr.msra.gmra.mxu1 %vm835_vm2, %v910_v43 }
 0xba1   :  { %v989_v45 = vpop.f32.mrf.mxu1 }
 0xba2   :  { %v990_v46 = vadd.f32 %v1066_v44, %v989_v45 }
 0xba3   :  { %v1245_v47 = vpop.f32.mrf.mxu1 }
 0xba4   :  { %v993_v48 = vsub.f32 0.0, %v990_v46 }
 0xba6   :  { %v994_v49 = vmul.f32 1.442695, %v993_v48 }
 0xba8   :  { %1256 = vpow2.f32 %v994_v49 }
 0xbb5   :  { %v1257_v50 = vpop.eup %1256 }
 0xbb6   :  { %v996_v51 = vadd.f32 1.0, %v1257_v50 }
 0xbb8   :  { %1258 = vrcp.f32 %v996_v51 }
 0xbc5   :  { %v1259_v0 = vpop.eup %1258 }
 0xbc6   :  { %1000 = vst.msk [vmem:[#allocation8] sm:$0x3] %vm999_vm11, %v1259_v0 }
 0xbc7   :  { %1311 = shalt.err (!%p1308_p0)
}
 0xbc8   :  { %1010 = dma.vmem_to_hbm [thread:$0]  %s1008_s22, 32, %s1571_s2, [#allocation5]  }
 0xbc9   :  { %1324 = dma.done.wait [#allocation5], 32  }
 0xbca   :  { %1325 = vsyncadd [#allocation5], 4294967264 }
 0xbcb   :  { %1014 = vsyncpa [#allocation4], 1 }
 0xbcc   :  { %1015 = vsyncpa [#allocation7], 1 }
 0xbcd   :  { %1016 = vsyncpa [#allocation5], 1 }

</bundles_post_ra>
